<compile_context>
chip_gen: v7x
topology: tpu7x:2x2x1
jax: 0.10.0
libtpu: 0.0.40
codegen_flags: <defaults>
</compile_context>

<pallas_src>
import functools

import jax
import jax.numpy as jnp
import numpy as np
from jax.experimental import pallas as pl
from jax.experimental.pallas import tpu as pltpu


# ----------------------------------------------------------------------------
# Kernel 1: spectral complex multiply, both corners + real/imag fused.
#   out[b, (d, corner, t, q)] = sum_c x[b, c, (corner, t, q)] * w[c, (d, corner, t, q)]
# (complex arithmetic; x already broadcast over d in the wrapper so that the
#  last axis L = D * 2 * n_modes^2 is lane-dense.)
# ----------------------------------------------------------------------------
def _spectral_mul_kernel(xr_ref, xi_ref, wr_ref, wi_ref, o_ref):
    C = xr_ref.shape[0]
    acc_r = jnp.zeros(xr_ref.shape[1:], jnp.float32)   # (B, L)
    acc_i = jnp.zeros(xr_ref.shape[1:], jnp.float32)
    for c in range(C):  # static, small channel count -> unrolled broadcast-FMAs
        xr = xr_ref[c]      # (B, L)
        xi = xi_ref[c]
        wr = wr_ref[c]      # (1, L) -> sublane-broadcast against (B, L)
        wi = wi_ref[c]
        acc_r = acc_r + xr * wr - xi * wi
        acc_i = acc_i + xi * wr + xr * wi
    o_ref[0] = acc_r        # lane-dense, unmasked stores (L == 128 here)
    o_ref[1] = acc_i


def spectral_mul(x_ft, w1, w2, n_modes):
    """Both frequency corners in one pallas_call.

    x_ft: (B, C, H, Wf) complex64 rfft2 output.
    w1, w2: (C_in, C_out, nm, nm, 2) real weights (einsum 'bctq,dctq->bdtq').
    Returns complex (B, D, 2, nm, nm): corner 0 = low/low, corner 1 = high/low.
    """
    B, C, Hdim, _ = x_ft.shape
    nm = n_modes
    M = nm * nm
    D = w1.shape[0]          # einsum output-channel axis is weight dim 0
    L = D * 2 * M            # lane axis: (d, corner, t, q)

    # gather the two corners: (B, C, 2, nm, nm)
    xc = jnp.stack([x_ft[:, :, :nm, :nm], x_ft[:, :, Hdim - nm:, :nm]], axis=2)
    xr = jnp.real(xc).astype(jnp.float32).reshape(B, C, 2 * M)
    xi = jnp.imag(xc).astype(jnp.float32).reshape(B, C, 2 * M)

    def expand(a):  # broadcast over d and move channels to the leading axis
        a = jnp.broadcast_to(a[:, :, None, :], (B, C, D, 2 * M)).reshape(B, C, L)
        return jnp.transpose(a, (1, 0, 2))          # (C, B, L)

    xr_e, xi_e = expand(xr), expand(xi)

    # weights: einsum indexes w[d, c, t, q]; kernel wants [c, (d, corner, t, q)]
    w = jnp.stack([w1, w2], axis=2)                 # (d, c, corner, t, q, reim)
    w = jnp.transpose(w, (1, 0, 2, 3, 4, 5))        # (c, d, corner, t, q, reim)
    wr = w[..., 0].astype(jnp.float32).reshape(C, 1, L)
    wi = w[..., 1].astype(jnp.float32).reshape(C, 1, L)

    vmem = pl.BlockSpec(memory_space=pltpu.MemorySpace.VMEM)
    out = pl.pallas_call(
        _spectral_mul_kernel,
        out_shape=jax.ShapeDtypeStruct((2, B, L), jnp.float32),
        in_specs=[vmem, vmem, vmem, vmem],
        out_specs=vmem,
    )(xr_e, xi_e, wr, wi)

    oc = (out[0] + 1j * out[1]).reshape(B, D, 2, nm, nm)
    return oc


# ----------------------------------------------------------------------------
# Kernel 2: fused shortcut (1x1 conv as one wide matmul) + residual add +
# BatchNorm2d (training-mode batch statistics, biased variance) + ReLU.
# Single pass over the data; channels on sublanes, B*H*W on lanes.
# ----------------------------------------------------------------------------
def _fused_block_kernel(x_ref, spec_ref, w_ref, gamma_ref, beta_ref, o_ref,
                        *, activation, eps, inv_n):
    x = x_ref[...]                                      # (C, N)
    # one MXU matmul: (C_out, C_in) @ (C_in, N)
    sc = jnp.dot(w_ref[...], x, preferred_element_type=jnp.float32)
    # shortcut bias omitted: cancelled exactly by training-mode BN mean removal
    t = spec_ref[...] + sc                              # (C, N), stays live

    # batch-norm statistics over (batch, spatial) per channel (lane reduce)
    s = jnp.sum(t, axis=1, keepdims=True)               # (C, 1)
    sq = jnp.sum(t * t, axis=1, keepdims=True)
    mean = s * inv_n
    var = jnp.maximum(sq * inv_n - mean * mean, 0.0)    # biased, clamped >= 0
    inv = jax.lax.rsqrt(var + eps)                      # EUP
    scale = gamma_ref[...] * inv                        # (C, 1)
    shift = beta_ref[...] - mean * scale

    y = t * scale + shift
    if activation:
        y = jnp.maximum(y, 0.0)
    o_ref[...] = y                                      # lane-dense store


def fused_shortcut_bn_relu(x, spec, w_sc, gamma, beta, activation=True, eps=1e-5):
    B, C, H, W = x.shape
    N = B * H * W
    # channels -> sublanes, (batch, spatial) -> lanes (lane-dense, N mult of 128)
    x_cn = jnp.transpose(x, (1, 0, 2, 3)).reshape(C, N)
    s_cn = jnp.transpose(spec, (1, 0, 2, 3)).reshape(C, N)

    vmem = pl.BlockSpec(memory_space=pltpu.MemorySpace.VMEM)
    kernel = functools.partial(_fused_block_kernel, activation=activation,
                               eps=eps, inv_n=1.0 / N)
    out = pl.pallas_call(
        kernel,
        out_shape=jax.ShapeDtypeStruct((C, N), jnp.float32),
        in_specs=[vmem] * 5,
        out_specs=vmem,
    )(x_cn, s_cn, w_sc, gamma, beta)
    return jnp.transpose(out.reshape(C, B, H, W), (1, 0, 2, 3))


# ----------------------------------------------------------------------------
# Full NeuralFourierBlock forward (glue in plain JAX, hot paths in Pallas)
# ----------------------------------------------------------------------------
def neural_fourier_block(x, params, n_modes, activation=True):
    B, C, H, W = x.shape
    nm = n_modes
    Wf = W // 2 + 1

    # TODO(synk): FFT has no Pallas TPU primitive; rfft2/irfft2 stay in XLA.
    x_ft = jnp.fft.rfft2(x, norm="ortho")              # (B, C, H, Wf) complex64

    oc = spectral_mul(x_ft, params["weights1"], params["weights2"], nm)

    out_ft = jnp.zeros((B, C, H, Wf), jnp.complex64)
    out_ft = out_ft.at[:, :, :nm, :nm].set(oc[:, :, 0])
    out_ft = out_ft.at[:, :, H - nm:, :nm].set(oc[:, :, 1])
    spec = jnp.fft.irfft2(out_ft, s=(H, W), norm="ortho").astype(jnp.float32)

    return fused_shortcut_bn_relu(
        x, spec, params["w_sc"], params["gamma"], params["beta"],
        activation=activation)


# ----------------------------------------------------------------------------
# Pure-JAX reference (mirrors the PyTorch module, for correctness check)
# ----------------------------------------------------------------------------
def reference_forward(x, params, n_modes, activation=True, eps=1e-5):
    B, C, H, W = x.shape
    nm = n_modes
    hi = jax.lax.Precision.HIGHEST
    x_ft = jnp.fft.rfft2(x, norm="ortho")

    def cmul(a, w):
        wc = (w[..., 0] + 1j * w[..., 1]).astype(jnp.complex64)
        return jnp.einsum('bctq,dctq->bdtq', a, wc, precision=hi)

    out_ft = jnp.zeros((B, C, H, W // 2 + 1), jnp.complex64)
    out_ft = out_ft.at[:, :, :nm, :nm].set(cmul(x_ft[:, :, :nm, :nm], params["weights1"]))
    out_ft = out_ft.at[:, :, H - nm:, :nm].set(cmul(x_ft[:, :, H - nm:, :nm], params["weights2"]))
    spec = jnp.fft.irfft2(out_ft, s=(H, W), norm="ortho")

    sc = jnp.einsum('dc,bcp->bdp', params["w_sc"], x.reshape(B, C, H * W),
                    precision=hi) + params["b_sc"]
    out = spec + sc.reshape(B, C, H, W)
    mean = out.mean(axis=(0, 2, 3), keepdims=True)
    var = out.var(axis=(0, 2, 3), keepdims=True)
    g = params["gamma"].reshape(1, C, 1, 1)
    be = params["beta"].reshape(1, C, 1, 1)
    out = (out - mean) / jnp.sqrt(var + eps) * g + be
    if activation:
        out = jnp.maximum(out, 0.0)
    return out


if __name__ == "__main__":
    B, width, H, W, n_modes = 2, 4, 16, 16, 4

    key = jax.random.PRNGKey(0)
    k1, k2, k3, k4, kx = jax.random.split(key, 5)
    scale = 1.0 / (width * width)
    params = {
        # SpectralConv2d weights: (in, out, n_modes, n_modes, 2), ~ scale*U[0,1)
        "weights1": scale * jax.random.uniform(k1, (width, width, n_modes, n_modes, 2),
                                               jnp.float32),
        "weights2": scale * jax.random.uniform(k2, (width, width, n_modes, n_modes, 2),
                                               jnp.float32),
        # Conv1d(width, width, 1): weight (out, in), bias (out, 1)
        "w_sc": jax.random.uniform(k3, (width, width), jnp.float32, -0.5, 0.5),
        "b_sc": jax.random.uniform(k4, (width, 1), jnp.float32, -0.5, 0.5),
        # BatchNorm2d affine params (default init)
        "gamma": jnp.ones((width, 1), jnp.float32),
        "beta": jnp.zeros((width, 1), jnp.float32),
    }
    x = jax.random.normal(kx, (B, width, H, W), jnp.float32)

    # Jit the whole forward so the XLA-side plumbing (FFT, transposes,
    # broadcast, frequency scatter) fuses around the two Pallas kernels.
    fwd = jax.jit(functools.partial(neural_fourier_block,
                                    n_modes=n_modes, activation=True))
    out = jax.block_until_ready(fwd(x, params))

    ref = reference_forward(x, params, n_modes, activation=True)
    assert out.shape == (B, width, H, W)
    np.testing.assert_allclose(np.asarray(out), np.asarray(ref), rtol=2e-3, atol=2e-3)

    print("KERNEL_OK")
</pallas_src>

<mosaic_0001>
module attributes {stable_mosaic.version = 11 : i64} {
  func.func @_spectral_mul_kernel(%arg0: memref<4x2x128xf32, #tpu.memory_space<vmem>>, %arg1: memref<4x2x128xf32, #tpu.memory_space<vmem>>, %arg2: memref<4x1x128xf32, #tpu.memory_space<vmem>>, %arg3: memref<4x1x128xf32, #tpu.memory_space<vmem>>, %arg4: memref<2x2x128xf32, #tpu.memory_space<vmem>>) attributes {dimension_semantics = [], scalar_prefetch = 0 : i64, scratch_operands = 0 : i64, tpu.core_type = #tpu.core_type<tc>} {
    %cst = arith.constant 0.000000e+00 : f32
    %0 = vector.broadcast %cst : f32 to vector<2x128xf32>
    %cst_0 = arith.constant 0.000000e+00 : f32
    %1 = vector.broadcast %cst_0 : f32 to vector<2x128xf32>
    %c0 = arith.constant 0 : index
    %c0_1 = arith.constant 0 : index
    %c0_2 = arith.constant 0 : index
    %2 = vector.load %arg0[%c0, %c0_1, %c0_2] : memref<4x2x128xf32, #tpu.memory_space<vmem>>, vector<1x2x128xf32>
    %3 = vector.shape_cast %2 : vector<1x2x128xf32> to vector<2x128xf32>
    %c0_3 = arith.constant 0 : index
    %c0_4 = arith.constant 0 : index
    %c0_5 = arith.constant 0 : index
    %4 = vector.load %arg1[%c0_3, %c0_4, %c0_5] : memref<4x2x128xf32, #tpu.memory_space<vmem>>, vector<1x2x128xf32>
    %5 = vector.shape_cast %4 : vector<1x2x128xf32> to vector<2x128xf32>
    %c0_6 = arith.constant 0 : index
    %c0_7 = arith.constant 0 : index
    %c0_8 = arith.constant 0 : index
    %6 = vector.load %arg2[%c0_6, %c0_7, %c0_8] : memref<4x1x128xf32, #tpu.memory_space<vmem>>, vector<1x1x128xf32>
    %7 = vector.shape_cast %6 : vector<1x1x128xf32> to vector<1x128xf32>
    %c0_9 = arith.constant 0 : index
    %c0_10 = arith.constant 0 : index
    %c0_11 = arith.constant 0 : index
    %8 = vector.load %arg3[%c0_9, %c0_10, %c0_11] : memref<4x1x128xf32, #tpu.memory_space<vmem>>, vector<1x1x128xf32>
    %9 = vector.shape_cast %8 : vector<1x1x128xf32> to vector<1x128xf32>
    %10 = vector.broadcast %7 : vector<1x128xf32> to vector<2x128xf32>
    %11 = arith.mulf %3, %10 : vector<2x128xf32>
    %12 = arith.addf %0, %11 : vector<2x128xf32>
    %13 = vector.broadcast %9 : vector<1x128xf32> to vector<2x128xf32>
    %14 = arith.mulf %5, %13 : vector<2x128xf32>
    %15 = arith.subf %12, %14 : vector<2x128xf32>
    %16 = vector.broadcast %7 : vector<1x128xf32> to vector<2x128xf32>
    %17 = arith.mulf %5, %16 : vector<2x128xf32>
    %18 = arith.addf %1, %17 : vector<2x128xf32>
    %19 = vector.broadcast %9 : vector<1x128xf32> to vector<2x128xf32>
    %20 = arith.mulf %3, %19 : vector<2x128xf32>
    %21 = arith.addf %18, %20 : vector<2x128xf32>
    %c1 = arith.constant 1 : index
    %c0_12 = arith.constant 0 : index
    %c0_13 = arith.constant 0 : index
    %22 = vector.load %arg0[%c1, %c0_12, %c0_13] : memref<4x2x128xf32, #tpu.memory_space<vmem>>, vector<1x2x128xf32>
    %23 = vector.shape_cast %22 : vector<1x2x128xf32> to vector<2x128xf32>
    %c1_14 = arith.constant 1 : index
    %c0_15 = arith.constant 0 : index
    %c0_16 = arith.constant 0 : index
    %24 = vector.load %arg1[%c1_14, %c0_15, %c0_16] : memref<4x2x128xf32, #tpu.memory_space<vmem>>, vector<1x2x128xf32>
    %25 = vector.shape_cast %24 : vector<1x2x128xf32> to vector<2x128xf32>
    %c1_17 = arith.constant 1 : index
    %c0_18 = arith.constant 0 : index
    %c0_19 = arith.constant 0 : index
    %26 = vector.load %arg2[%c1_17, %c0_18, %c0_19] : memref<4x1x128xf32, #tpu.memory_space<vmem>>, vector<1x1x128xf32>
    %27 = vector.shape_cast %26 : vector<1x1x128xf32> to vector<1x128xf32>
    %c1_20 = arith.constant 1 : index
    %c0_21 = arith.constant 0 : index
    %c0_22 = arith.constant 0 : index
    %28 = vector.load %arg3[%c1_20, %c0_21, %c0_22] : memref<4x1x128xf32, #tpu.memory_space<vmem>>, vector<1x1x128xf32>
    %29 = vector.shape_cast %28 : vector<1x1x128xf32> to vector<1x128xf32>
    %30 = vector.broadcast %27 : vector<1x128xf32> to vector<2x128xf32>
    %31 = arith.mulf %23, %30 : vector<2x128xf32>
    %32 = arith.addf %15, %31 : vector<2x128xf32>
    %33 = vector.broadcast %29 : vector<1x128xf32> to vector<2x128xf32>
    %34 = arith.mulf %25, %33 : vector<2x128xf32>
    %35 = arith.subf %32, %34 : vector<2x128xf32>
    %36 = vector.broadcast %27 : vector<1x128xf32> to vector<2x128xf32>
    %37 = arith.mulf %25, %36 : vector<2x128xf32>
    %38 = arith.addf %21, %37 : vector<2x128xf32>
    %39 = vector.broadcast %29 : vector<1x128xf32> to vector<2x128xf32>
    %40 = arith.mulf %23, %39 : vector<2x128xf32>
    %41 = arith.addf %38, %40 : vector<2x128xf32>
    %c2 = arith.constant 2 : index
    %c0_23 = arith.constant 0 : index
    %c0_24 = arith.constant 0 : index
    %42 = vector.load %arg0[%c2, %c0_23, %c0_24] : memref<4x2x128xf32, #tpu.memory_space<vmem>>, vector<1x2x128xf32>
    %43 = vector.shape_cast %42 : vector<1x2x128xf32> to vector<2x128xf32>
    %c2_25 = arith.constant 2 : index
    %c0_26 = arith.constant 0 : index
    %c0_27 = arith.constant 0 : index
    %44 = vector.load %arg1[%c2_25, %c0_26, %c0_27] : memref<4x2x128xf32, #tpu.memory_space<vmem>>, vector<1x2x128xf32>
    %45 = vector.shape_cast %44 : vector<1x2x128xf32> to vector<2x128xf32>
    %c2_28 = arith.constant 2 : index
    %c0_29 = arith.constant 0 : index
    %c0_30 = arith.constant 0 : index
    %46 = vector.load %arg2[%c2_28, %c0_29, %c0_30] : memref<4x1x128xf32, #tpu.memory_space<vmem>>, vector<1x1x128xf32>
    %47 = vector.shape_cast %46 : vector<1x1x128xf32> to vector<1x128xf32>
    %c2_31 = arith.constant 2 : index
    %c0_32 = arith.constant 0 : index
    %c0_33 = arith.constant 0 : index
    %48 = vector.load %arg3[%c2_31, %c0_32, %c0_33] : memref<4x1x128xf32, #tpu.memory_space<vmem>>, vector<1x1x128xf32>
    %49 = vector.shape_cast %48 : vector<1x1x128xf32> to vector<1x128xf32>
    %50 = vector.broadcast %47 : vector<1x128xf32> to vector<2x128xf32>
    %51 = arith.mulf %43, %50 : vector<2x128xf32>
    %52 = arith.addf %35, %51 : vector<2x128xf32>
    %53 = vector.broadcast %49 : vector<1x128xf32> to vector<2x128xf32>
    %54 = arith.mulf %45, %53 : vector<2x128xf32>
    %55 = arith.subf %52, %54 : vector<2x128xf32>
    %56 = vector.broadcast %47 : vector<1x128xf32> to vector<2x128xf32>
    %57 = arith.mulf %45, %56 : vector<2x128xf32>
    %58 = arith.addf %41, %57 : vector<2x128xf32>
    %59 = vector.broadcast %49 : vector<1x128xf32> to vector<2x128xf32>
    %60 = arith.mulf %43, %59 : vector<2x128xf32>
    %61 = arith.addf %58, %60 : vector<2x128xf32>
    %c3 = arith.constant 3 : index
    %c0_34 = arith.constant 0 : index
    %c0_35 = arith.constant 0 : index
    %62 = vector.load %arg0[%c3, %c0_34, %c0_35] : memref<4x2x128xf32, #tpu.memory_space<vmem>>, vector<1x2x128xf32>
    %63 = vector.shape_cast %62 : vector<1x2x128xf32> to vector<2x128xf32>
    %c3_36 = arith.constant 3 : index
    %c0_37 = arith.constant 0 : index
    %c0_38 = arith.constant 0 : index
    %64 = vector.load %arg1[%c3_36, %c0_37, %c0_38] : memref<4x2x128xf32, #tpu.memory_space<vmem>>, vector<1x2x128xf32>
    %65 = vector.shape_cast %64 : vector<1x2x128xf32> to vector<2x128xf32>
    %c3_39 = arith.constant 3 : index
    %c0_40 = arith.constant 0 : index
    %c0_41 = arith.constant 0 : index
    %66 = vector.load %arg2[%c3_39, %c0_40, %c0_41] : memref<4x1x128xf32, #tpu.memory_space<vmem>>, vector<1x1x128xf32>
    %67 = vector.shape_cast %66 : vector<1x1x128xf32> to vector<1x128xf32>
    %c3_42 = arith.constant 3 : index
    %c0_43 = arith.constant 0 : index
    %c0_44 = arith.constant 0 : index
    %68 = vector.load %arg3[%c3_42, %c0_43, %c0_44] : memref<4x1x128xf32, #tpu.memory_space<vmem>>, vector<1x1x128xf32>
    %69 = vector.shape_cast %68 : vector<1x1x128xf32> to vector<1x128xf32>
    %70 = vector.broadcast %67 : vector<1x128xf32> to vector<2x128xf32>
    %71 = arith.mulf %63, %70 : vector<2x128xf32>
    %72 = arith.addf %55, %71 : vector<2x128xf32>
    %73 = vector.broadcast %69 : vector<1x128xf32> to vector<2x128xf32>
    %74 = arith.mulf %65, %73 : vector<2x128xf32>
    %75 = arith.subf %72, %74 : vector<2x128xf32>
    %76 = vector.broadcast %67 : vector<1x128xf32> to vector<2x128xf32>
    %77 = arith.mulf %65, %76 : vector<2x128xf32>
    %78 = arith.addf %61, %77 : vector<2x128xf32>
    %79 = vector.broadcast %69 : vector<1x128xf32> to vector<2x128xf32>
    %80 = arith.mulf %63, %79 : vector<2x128xf32>
    %81 = arith.addf %78, %80 : vector<2x128xf32>
    %c0_45 = arith.constant 0 : index
    %c0_46 = arith.constant 0 : index
    %c0_47 = arith.constant 0 : index
    %82 = vector.load %arg4[%c0_45, %c0_46, %c0_47] : memref<2x2x128xf32, #tpu.memory_space<vmem>>, vector<1x2x128xf32>
    %83 = vector.shape_cast %82 : vector<1x2x128xf32> to vector<2x128xf32>
    %84 = vector.shape_cast %75 : vector<2x128xf32> to vector<1x2x128xf32>
    tpu.vector_store %arg4[%c0_45, %c0_46, %c0_47], %84 {strides = array<i32>} : memref<2x2x128xf32, #tpu.memory_space<vmem>>, vector<1x2x128xf32>,
    %c1_48 = arith.constant 1 : index
    %c0_49 = arith.constant 0 : index
    %c0_50 = arith.constant 0 : index
    %85 = vector.load %arg4[%c1_48, %c0_49, %c0_50] : memref<2x2x128xf32, #tpu.memory_space<vmem>>, vector<1x2x128xf32>
    %86 = vector.shape_cast %85 : vector<1x2x128xf32> to vector<2x128xf32>
    %87 = vector.shape_cast %81 : vector<2x128xf32> to vector<1x2x128xf32>
    tpu.vector_store %arg4[%c1_48, %c0_49, %c0_50], %87 {strides = array<i32>} : memref<2x2x128xf32, #tpu.memory_space<vmem>>, vector<1x2x128xf32>,
    return
  }
}

module attributes {stable_mosaic.version = 11 : i64} {
  func.func @_fused_block_kernel(%arg0: memref<4x512xf32, #tpu.memory_space<vmem>>, %arg1: memref<4x512xf32, #tpu.memory_space<vmem>>, %arg2: memref<4x4xf32, #tpu.memory_space<vmem>>, %arg3: memref<4x1xf32, #tpu.memory_space<vmem>>, %arg4: memref<4x1xf32, #tpu.memory_space<vmem>>, %arg5: memref<4x512xf32, #tpu.memory_space<vmem>>) attributes {dimension_semantics = [], scalar_prefetch = 0 : i64, scratch_operands = 0 : i64, tpu.core_type = #tpu.core_type<tc>} {
    %c0 = arith.constant 0 : index
    %c0_0 = arith.constant 0 : index
    %0 = vector.load %arg0[%c0, %c0_0] : memref<4x512xf32, #tpu.memory_space<vmem>>, vector<4x512xf32>
    %c0_1 = arith.constant 0 : index
    %c0_2 = arith.constant 0 : index
    %1 = vector.load %arg2[%c0_1, %c0_2] : memref<4x4xf32, #tpu.memory_space<vmem>>, vector<4x4xf32>
    %cst = arith.constant dense<0.000000e+00> : vector<4x512xf32>
    %2 = tpu.matmul %1, %0, %cst {dimension_numbers = #tpu.dot_dimension_numbers<[1], [0], [0], [1], [0, 0, 1, 1], [], []>} : vector<4x4xf32>, vector<4x512xf32>, vector<4x512xf32> -> vector<4x512xf32>
    %c0_3 = arith.constant 0 : index
    %c0_4 = arith.constant 0 : index
    %3 = vector.load %arg1[%c0_3, %c0_4] : memref<4x512xf32, #tpu.memory_space<vmem>>, vector<4x512xf32>
    %4 = arith.addf %3, %2 : vector<4x512xf32>
    %cst_5 = arith.constant dense<0.000000e+00> : vector<4xf32>
    %5 = vector.multi_reduction <add>, %4, %cst_5 [1] : vector<4x512xf32> to vector<4xf32>
    %6 = vector.shape_cast %5 : vector<4xf32> to vector<4x1xf32>
    %7 = arith.mulf %4, %4 : vector<4x512xf32>
    %cst_6 = arith.constant dense<0.000000e+00> : vector<4xf32>
    %8 = vector.multi_reduction <add>, %7, %cst_6 [1] : vector<4x512xf32> to vector<4xf32>
    %9 = vector.shape_cast %8 : vector<4xf32> to vector<4x1xf32>
    %cst_7 = arith.constant 0.001953125 : f32
    %10 = vector.broadcast %cst_7 : f32 to vector<4x1xf32>
    %11 = arith.mulf %6, %10 : vector<4x1xf32>
    %cst_8 = arith.constant 0.001953125 : f32
    %12 = vector.broadcast %cst_8 : f32 to vector<4x1xf32>
    %13 = arith.mulf %9, %12 : vector<4x1xf32>
    %14 = arith.mulf %11, %11 : vector<4x1xf32>
    %15 = arith.subf %13, %14 : vector<4x1xf32>
    %cst_9 = arith.constant 0.000000e+00 : f32
    %16 = vector.broadcast %cst_9 : f32 to vector<4x1xf32>
    %17 = arith.maximumf %15, %16 : vector<4x1xf32>
    %cst_10 = arith.constant 9.99999974E-6 : f32
    %18 = vector.broadcast %cst_10 : f32 to vector<4x1xf32>
    %19 = arith.addf %17, %18 : vector<4x1xf32>
    %20 = math.rsqrt %19 : vector<4x1xf32>
    %c0_11 = arith.constant 0 : index
    %c0_12 = arith.constant 0 : index
    %21 = vector.load %arg3[%c0_11, %c0_12] : memref<4x1xf32, #tpu.memory_space<vmem>>, vector<4x1xf32>
    %22 = arith.mulf %21, %20 : vector<4x1xf32>
    %c0_13 = arith.constant 0 : index
    %c0_14 = arith.constant 0 : index
    %23 = vector.load %arg4[%c0_13, %c0_14] : memref<4x1xf32, #tpu.memory_space<vmem>>, vector<4x1xf32>
    %24 = arith.mulf %11, %22 : vector<4x1xf32>
    %25 = arith.subf %23, %24 : vector<4x1xf32>
    %26 = vector.broadcast %22 : vector<4x1xf32> to vector<4x512xf32>
    %27 = arith.mulf %4, %26 : vector<4x512xf32>
    %28 = vector.broadcast %25 : vector<4x1xf32> to vector<4x512xf32>
    %29 = arith.addf %27, %28 : vector<4x512xf32>
    %cst_15 = arith.constant 0.000000e+00 : f32
    %30 = vector.broadcast %cst_15 : f32 to vector<4x512xf32>
    %31 = arith.maximumf %29, %30 : vector<4x512xf32>
    %c0_16 = arith.constant 0 : index
    %c0_17 = arith.constant 0 : index
    %32 = vector.load %arg5[%c0_16, %c0_17] : memref<4x512xf32, #tpu.memory_space<vmem>>, vector<4x512xf32>
    tpu.vector_store %arg5[%c0_16, %c0_17], %31 {strides = array<i32>} : memref<4x512xf32, #tpu.memory_space<vmem>>, vector<4x512xf32>,
    return
  }
}

</mosaic_0001>

<bundles_post_ra>
// kernel: squeeze.6
= control target key start
LH: loop header
LB: loop body
LE: loop exit
PB: predicated region body
PF: predicated region fallthrough
CT: control target
= control target key end

     0   :  { %vm163_vm0 = vcmask 1041409   ;;  %vm167_vm1 = vcmask 1042434   ;;  %vm171_vm2 = vcmask 1043459   ;;  %s853_s9 = smov 124   ;;  %s854_s10 = smov 116   ;;  %vm173_vm3 = vcmask 31744   ;;  %s1099_s0 = inlined_call_operand.vmem [shape: f32[4,4,2,4,4,1], index: 0, kind: input, shape index: {}]   ;;  %s1100_s1 = inlined_call_operand.vmem [shape: f32[4,1,128], index: 1, kind: output, shape index: {}]  }
   0x1   :  { %v788_v0 = vld [vmem:[%s1099_s0 + $0x7c] sm:$0xf]  ;;  %v789_v4 = vld [vmem:[%s1099_s0 + $0x78] sm:$0xf]  ;;  %v790_v8 = vld [vmem:[%s1099_s0 + $0x74] sm:$0xf] }
   0x2   :  { %v796_v1 = vld [vmem:[%s1099_s0 + $0x5c] sm:$0xf]  ;;  %8 = vst [vmem:[#allocation1 + $0xf8] sm:$0xf] %v788_v0  ;;  %v797_v5 = vld [vmem:[%s1099_s0 + $0x58] sm:$0xf] }
   0x3   :  { %v804_v2 = vld [vmem:[%s1099_s0 + $0x3c] sm:$0xf]  ;;  %48 = vst [vmem:[#allocation1 + $0xb8] sm:$0xf] %v796_v1  ;;  %13 = vst [vmem:[#allocation1 + $0xf0] sm:$0xf] %v789_v4 }
   0x4   :  { %88 = vst [vmem:[#allocation1 + $0x78] sm:$0xf] %v804_v2  ;;  %v812_v3 = vld [vmem:[%s1099_s0 + $0x1c] sm:$0xf]  ;;  %53 = vst [vmem:[#allocation1 + $0xb0] sm:$0xf] %v797_v5 }
   0x5   :  { %128 = vst [vmem:[#allocation1 + $0x38] sm:$0xf] %v812_v3  ;;  %v805_v6 = vld [vmem:[%s1099_s0 + $0x38] sm:$0xf]  ;;  %v798_v9 = vld [vmem:[%s1099_s0 + $0x54] sm:$0xf] }
   0x6   :  { %v813_v7 = vld [vmem:[%s1099_s0 + $0x18] sm:$0xf]  ;;  %93 = vst [vmem:[#allocation1 + $0x70] sm:$0xf] %v805_v6  ;;  %18 = vst [vmem:[#allocation1 + $0xe8] sm:$0xf] %v790_v8 }
   0x7   :  { %133 = vst [vmem:[#allocation1 + $0x30] sm:$0xf] %v813_v7  ;;  %58 = vst [vmem:[#allocation1 + $0xa8] sm:$0xf] %v798_v9  ;;  %v806_v10 = vld [vmem:[%s1099_s0 + $0x34] sm:$0xf] }
   0x8   :  { %v814_v11 = vld [vmem:[%s1099_s0 + $0x14] sm:$0xf]  ;;  %98 = vst [vmem:[#allocation1 + $0x68] sm:$0xf] %v806_v10  ;;  %v791_v12 = vld [vmem:[%s1099_s0 + $0x70] sm:$0xf] }
   0x9   :  { %138 = vst [vmem:[#allocation1 + $0x28] sm:$0xf] %v814_v11  ;;  %v799_v13 = vld [vmem:[%s1099_s0 + $0x50] sm:$0xf]  ;;  %23 = vst [vmem:[#allocation1 + $0xe0] sm:$0xf] %v791_v12 }
   0xa   :  { %63 = vst [vmem:[#allocation1 + $0xa0] sm:$0xf] %v799_v13  ;;  %v807_v14 = vld [vmem:[%s1099_s0 + $0x30] sm:$0xf]  ;;  %v182_v17 = vld [vmem:[#allocation1 + $0xb9] sm:$0x4]  }
   0xb   :  { %v815_v15 = vld [vmem:[%s1099_s0 + $0x10] sm:$0xf]  ;;  %v178_v16 = vld [vmem:[#allocation1 + $0x7a] sm:$0x2]   ;;  %103 = vst [vmem:[#allocation1 + $0x60] sm:$0xf] %v807_v14 }
   0xc   :  { %v186_v18 = vld [vmem:[#allocation1 + $0xf8] sm:$0x8]   ;;  %143 = vst [vmem:[#allocation1 + $0x20] sm:$0xf] %v815_v15  ;;  %v212_v20 = vld [vmem:[#allocation1 + $0x39] sm:$0x1]  }
   0xd   :  { %v176_v19 = vld [vmem:[#allocation1 + $0x3b] sm:$0x1]   ;;  %v214_v21 = vld [vmem:[#allocation1 + $0x78] sm:$0x2]   ;;  %v194_v26 = vld [vmem:[#allocation1 + $0x3a] sm:$0x1]  }
   0xe   :  { %v180_v22 = vsel %vm163_vm0, %v178_v16, %v176_v19  ;;  %v216_v23 = vsel %vm163_vm0, %v214_v21, %v212_v20  ;;  %v218_v24 = vld [vmem:[#allocation1 + $0xb7] sm:$0x4]   ;;  %v196_v29 = vld [vmem:[#allocation1 + $0x79] sm:$0x2]   ;;  %v230_v35 = vld [vmem:[#allocation1 + $0x38] sm:$0x1]  }
   0xf   :  { %v222_v25 = vld [vmem:[#allocation1 + $0xf6] sm:$0x8]   ;;  %v184_v27 = vsel %vm167_vm1, %v182_v17, %v180_v22  ;;  %v220_v28 = vsel %vm167_vm1, %v218_v24, %v216_v23  ;;  %v200_v30 = vld [vmem:[#allocation1 + $0xb8] sm:$0x4]   ;;  %v198_v34 = vsel %vm163_vm0, %v196_v29, %v194_v26  ;;  %v232_v36 = vld [vmem:[#allocation1 + $0x77] sm:$0x2]  }
  0x10   :  { %v204_v31 = vld [vmem:[#allocation1 + $0xf7] sm:$0x8]   ;;  %v188_v32 = vsel %vm171_vm2, %v186_v18, %v184_v27  ;;  %v224_v33 = vsel %vm171_vm2, %v222_v25, %v220_v28  ;;  %v236_v37 = vld [vmem:[#allocation1 + $0xb6] sm:$0x4]   ;;  %v202_v38 = vsel %vm167_vm1, %v200_v30, %v198_v34  ;;  %v234_v39 = vsel %vm163_vm0, %v232_v36, %v230_v35  ;;  %v248_v41 = vld [vmem:[#allocation1 + $0x33] sm:$0x1]  }
  0x11   :  { %189 = vrot.lane.b32.xlu0 %v188_v32, %s853_s9  ;;  %225 = vrot.lane.b32.xlu1 %v224_v33, %s854_s10  ;;  %v240_v40 = vld [vmem:[#allocation1 + $0xf5] sm:$0x8]   ;;  %v250_v42 = vld [vmem:[#allocation1 + $0x72] sm:$0x2]   ;;  %v206_v43 = vsel %vm171_vm2, %v204_v31, %v202_v38  ;;  %v238_v44 = vsel %vm167_vm1, %v236_v37, %v234_v39  ;;  %v266_v48 = vld [vmem:[#allocation1 + $0x32] sm:$0x1]  }
  0x12   :  { %v252_v45 = vsel %vm163_vm0, %v250_v42, %v248_v41  ;;  %v254_v46 = vld [vmem:[#allocation1 + $0xb1] sm:$0x4]   ;;  %v242_v49 = vsel %vm171_vm2, %v240_v40, %v238_v44  ;;  %v268_v51 = vld [vmem:[#allocation1 + $0x71] sm:$0x2]   ;;  %v284_v55 = vld [vmem:[#allocation1 + $0x31] sm:$0x1]  }
  0x13   :  { %v258_v47 = vld [vmem:[#allocation1 + $0xf0] sm:$0x8]   ;;  %v256_v50 = vsel %vm167_vm1, %v254_v46, %v252_v45  ;;  %v272_v52 = vld [vmem:[#allocation1 + $0xb0] sm:$0x4]   ;;  %v270_v54 = vsel %vm163_vm0, %v268_v51, %v266_v48  ;;  %v286_v56 = vld [vmem:[#allocation1 + $0x70] sm:$0x2]  }
  0x14   :  { %v276_v53 = vld [vmem:[#allocation1 + $0xef] sm:$0x8]   ;;  %v290_v57 = vld [vmem:[#allocation1 + $0xaf] sm:$0x4]   ;;  %s855_s11 = smov 120   ;;  %s856_s12 = smov 112   ;;  %v274_v58 = vsel %vm167_vm1, %v272_v52, %v270_v54  ;;  %v288_v59 = vsel %vm163_vm0, %v286_v56, %v284_v55  ;;  %v260_v62 = vsel %vm171_vm2, %v258_v47, %v256_v50 }
  0x15   :  { %207 = vrot.lane.b32.xlu0 %v206_v43, %s855_s11  ;;  %243 = vrot.lane.b32.xlu1 %v242_v49, %s856_s12  ;;  %v302_v60 = vld [vmem:[#allocation1 + $0x30] sm:$0x1]   ;;  %v278_v63 = vsel %vm171_vm2, %v276_v53, %v274_v58  ;;  %v294_v0 = vld [vmem:[#allocation1 + $0xee] sm:$0x8]   ;;  %v320_v3 = vld [vmem:[#allocation1 + $0x2b] sm:$0x1]   ;;  %v292_v4 = vsel %vm167_vm1, %v290_v57, %v288_v59 }
  0x16   :  { %v304_v61 = vld [vmem:[#allocation1 + $0x6f] sm:$0x2]   ;;  %v322_v7 = vld [vmem:[#allocation1 + $0x6a] sm:$0x2]   ;;  %v338_v10 = vld [vmem:[#allocation1 + $0x2a] sm:$0x1]   ;;  %v296_v16 = vsel %vm171_vm2, %v294_v0, %v292_v4 }
  0x17   :  { %v306_v1 = vsel %vm163_vm0, %v304_v61, %v302_v60  ;;  %v308_v2 = vld [vmem:[#allocation1 + $0xae] sm:$0x4]   ;;  %v326_v8 = vld [vmem:[#allocation1 + $0xa9] sm:$0x4]   ;;  %v324_v9 = vsel %vm163_vm0, %v322_v7, %v320_v3  ;;  %v340_v11 = vld [vmem:[#allocation1 + $0x69] sm:$0x2]  }
  0x18   :  { %v310_v5 = vsel %vm167_vm1, %v308_v2, %v306_v1  ;;  %v312_v6 = vld [vmem:[#allocation1 + $0xed] sm:$0x8]   ;;  %v344_v12 = vld [vmem:[#allocation1 + $0xa8] sm:$0x4]   ;;  %s857_s13 = smov 108   ;;  %s858_s14 = smov 104   ;;  %v342_v13 = vsel %vm163_vm0, %v340_v11, %v338_v10  ;;  %v328_v19 = vsel %vm167_vm1, %v326_v8, %v324_v9 }
  0x19   :  { %261 = vrot.lane.b32.xlu0 %v260_v62, %s857_s13  ;;  %279 = vrot.lane.b32.xlu1 %v278_v63, %s858_s14  ;;  %v356_v14 = vld [vmem:[#allocation1 + $0x29] sm:$0x1]   ;;  %v314_v17 = vsel %vm171_vm2, %v312_v6, %v310_v5  ;;  %v374_v18 = vld [vmem:[#allocation1 + $0x28] sm:$0x1]   ;;  %v330_v20 = vld [vmem:[#allocation1 + $0xe8] sm:$0x8]   ;;  %v346_v21 = vsel %vm167_vm1, %v344_v12, %v342_v13 }
  0x1a   :  { %v358_v15 = vld [vmem:[#allocation1 + $0x68] sm:$0x2]   ;;  %v348_v22 = vld [vmem:[#allocation1 + $0xe7] sm:$0x8]   ;;  %v376_v23 = vld [vmem:[#allocation1 + $0x67] sm:$0x2]   ;;  %v332_v32 = vsel %vm171_vm2, %v330_v20, %v328_v19 }
  0x1b   :  { %v360_v24 = vsel %vm163_vm0, %v358_v15, %v356_v14  ;;  %v362_v25 = vld [vmem:[#allocation1 + $0xa7] sm:$0x4]   ;;  %v378_v26 = vsel %vm163_vm0, %v376_v23, %v374_v18  ;;  %v380_v27 = vld [vmem:[#allocation1 + $0xa6] sm:$0x4]   ;;  %v392_v28 = vld [vmem:[#allocation1 + $0x23] sm:$0x1]   ;;  %v350_v33 = vsel %vm171_vm2, %v348_v22, %v346_v21 }
  0x1c   :  { %s859_s15 = smov 100   ;;  %s860_s16 = smov 96   ;;  %v394_v29 = vld [vmem:[#allocation1 + $0x62] sm:$0x2]   ;;  %v410_v30 = vld [vmem:[#allocation1 + $0x22] sm:$0x1]   ;;  %v364_v34 = vsel %vm167_vm1, %v362_v25, %v360_v24  ;;  %v382_v36 = vsel %vm167_vm1, %v380_v27, %v378_v26 }
  0x1d   :  { %297 = vrot.lane.b32.xlu0 %v296_v16, %s859_s15  ;;  %315 = vrot.lane.b32.xlu1 %v314_v17, %s860_s16  ;;  %v412_v31 = vld [vmem:[#allocation1 + $0x61] sm:$0x2]   ;;  %v366_v35 = vld [vmem:[#allocation1 + $0xe6] sm:$0x8]   ;;  %v384_v37 = vld [vmem:[#allocation1 + $0xe5] sm:$0x8]   ;;  %v396_v38 = vsel %vm163_vm0, %v394_v29, %v392_v28 }
  0x1e   :  { %v398_v39 = vld [vmem:[#allocation1 + $0xa1] sm:$0x4]   ;;  %v414_v40 = vsel %vm163_vm0, %v412_v31, %v410_v30  ;;  %v416_v41 = vld [vmem:[#allocation1 + $0xa0] sm:$0x4]   ;;  %v428_v42 = vld [vmem:[#allocation1 + $0x21] sm:$0x1]   ;;  %v368_v48 = vsel %vm171_vm2, %v366_v35, %v364_v34  ;;  %v386_v49 = vsel %vm171_vm2, %v384_v37, %v382_v36 }
  0x1f   :  { %s861_s17 = smov 92   ;;  %s862_s18 = smov 88   ;;  %v402_v43 = vld [vmem:[#allocation1 + $0xe0] sm:$0x8]   ;;  %v420_v44 = vld [vmem:[#allocation1 + $0xdf] sm:$0x8]   ;;  %v400_v53 = vsel %vm167_vm1, %v398_v39, %v396_v38  ;;  %v418_v54 = vsel %vm167_vm1, %v416_v41, %v414_v40 }
  0x20   :  { %v430_v45 = vld [vmem:[#allocation1 + $0x60] sm:$0x2]   ;;  %v446_v46 = vld [vmem:[#allocation1 + $0x20] sm:$0x1]   ;;  %v792_v50 = vld [vmem:[%s1099_s0 + $0x6c] sm:$0xf]  ;;  %v404_v1 = vsel %vm171_vm2, %v402_v43, %v400_v53  ;;  %v422_v2 = vsel %vm171_vm2, %v420_v44, %v418_v54 }
  0x21   :  { %333 = vrot.lane.b32.xlu0 %v332_v32, %s861_s17  ;;  %351 = vrot.lane.b32.xlu1 %v350_v33, %s862_s18  ;;  %v448_v47 = vld [vmem:[#allocation1 + $0x5f] sm:$0x2]   ;;  %v800_v51 = vld [vmem:[%s1099_s0 + $0x4c] sm:$0xf]  ;;  %v434_v55 = vld [vmem:[#allocation1 + $0x9f] sm:$0x4]   ;;  %v432_v58 = vsel %vm163_vm0, %v430_v45, %v428_v42 }
  0x22   :  { %v808_v52 = vld [vmem:[%s1099_s0 + $0x2c] sm:$0xf]  ;;  %28 = vst [vmem:[#allocation1 + $0xd8] sm:$0xf] %v792_v50  ;;  %68 = vst [vmem:[#allocation1 + $0x98] sm:$0xf] %v800_v51  ;;  %v450_v59 = vsel %vm163_vm0, %v448_v47, %v446_v46  ;;  %v436_v6 = vsel %vm167_vm1, %v434_v55, %v432_v58 }
  0x23   :  { %108 = vst [vmem:[#allocation1 + $0x58] sm:$0xf] %v808_v52  ;;  %v816_v56 = vld [vmem:[%s1099_s0 + $0xc] sm:$0xf]  ;;  %v793_v57 = vld [vmem:[%s1099_s0 + $0x68] sm:$0xf] }
  0x24   :  { %v452_v60 = vld [vmem:[#allocation1 + $0x9e] sm:$0x4]   ;;  %148 = vst [vmem:[#allocation1 + $0x18] sm:$0xf] %v816_v56  ;;  %33 = vst [vmem:[#allocation1 + $0xd0] sm:$0xf] %v793_v57 }
  0x25   :  { %v801_v61 = vld [vmem:[%s1099_s0 + $0x48] sm:$0xf]  ;;  %s863_s4 = smov 84   ;;  %s864_s5 = smov 80   ;;  %v794_v0 = vld [vmem:[%s1099_s0 + $0x64] sm:$0xf]  ;;  %v454_v7 = vsel %vm167_vm1, %v452_v60, %v450_v59 }
  0x26   :  { %v809_v62 = vld [vmem:[%s1099_s0 + $0x28] sm:$0xf]  ;;  %369 = vrot.lane.b32.xlu0 %v368_v48, %s863_s4  ;;  %387 = vrot.lane.b32.xlu1 %v386_v49, %s864_s5  ;;  %73 = vst [vmem:[#allocation1 + $0x90] sm:$0xf] %v801_v61  ;;  %v438_v3 = vld [vmem:[#allocation1 + $0xde] sm:$0x8]  }
  0x27   :  { %113 = vst [vmem:[#allocation1 + $0x50] sm:$0xf] %v809_v62  ;;  %v817_v63 = vld [vmem:[%s1099_s0 + $0x8] sm:$0xf]  ;;  %38 = vst [vmem:[#allocation1 + $0xc8] sm:$0xf] %v794_v0  ;;  %v440_v14 = vsel %vm171_vm2, %v438_v3, %v436_v6 }
  0x28   :  { %153 = vst [vmem:[#allocation1 + $0x10] sm:$0xf] %v817_v63  ;;  %v802_v4 = vld [vmem:[%s1099_s0 + $0x44] sm:$0xf]  ;;  %v456_v8 = vld [vmem:[#allocation1 + $0xdd] sm:$0x8]  }
  0x29   :  { %v810_v5 = vld [vmem:[%s1099_s0 + $0x24] sm:$0xf]  ;;  %78 = vst [vmem:[#allocation1 + $0x88] sm:$0xf] %v802_v4  ;;  %v795_v10 = vld [vmem:[%s1099_s0 + $0x60] sm:$0xf]  ;;  %v458_v15 = vsel %vm171_vm2, %v456_v8, %v454_v7 }
  0x2a   :  { %118 = vst [vmem:[#allocation1 + $0x48] sm:$0xf] %v810_v5  ;;  %v818_v9 = vld [vmem:[%s1099_s0 + $0x4] sm:$0xf]  ;;  %43 = vst [vmem:[#allocation1 + $0xc0] sm:$0xf] %v795_v10 }
  0x2b   :  { %157 = vst [vmem:[#allocation1 + $0x8] sm:$0xf] %v818_v9  ;;  %v803_v11 = vld [vmem:[%s1099_s0 + $0x40] sm:$0xf]  ;;  %s865_s22 = smov 76   ;;  %s866_s23 = smov 72  }
  0x2c   :  { %v811_v12 = vld [vmem:[%s1099_s0 + $0x20] sm:$0xf]  ;;  %405 = vrot.lane.b32.xlu0 %v404_v1, %s865_s22  ;;  %423 = vrot.lane.b32.xlu1 %v422_v2, %s866_s23  ;;  %83 = vst [vmem:[#allocation1 + $0x80] sm:$0xf] %v803_v11  ;;  %v466_v16 = vld [vmem:[#allocation1 + $0x5a] sm:$0x2]  }
  0x2d   :  { %123 = vst [vmem:[#allocation1 + $0x40] sm:$0xf] %v811_v12  ;;  %v158_v13 = vld [vmem:[%s1099_s0] sm:$0xf]  ;;  %v470_v17 = vld [vmem:[#allocation1 + $0x99] sm:$0x4]  }
  0x2e   :  { %v474_v18 = vld [vmem:[#allocation1 + $0xd8] sm:$0x8]   ;;  %159 = vst [vmem:[#allocation1] sm:$0xf] %v158_v13  ;;  %v482_v20 = vld [vmem:[#allocation1 + $0x1a] sm:$0x1]  }
  0x2f   :  { %v464_v19 = vld [vmem:[#allocation1 + $0x1b] sm:$0x1]   ;;  %v484_v21 = vld [vmem:[#allocation1 + $0x59] sm:$0x2]   ;;  %v500_v26 = vld [vmem:[#allocation1 + $0x19] sm:$0x1]  }
  0x30   :  { %v468_v22 = vsel %vm163_vm0, %v466_v16, %v464_v19  ;;  %v486_v23 = vsel %vm163_vm0, %v484_v21, %v482_v20  ;;  %v488_v24 = vld [vmem:[#allocation1 + $0x98] sm:$0x4]   ;;  %s867_s0 = smov 68   ;;  %s868_s26 = smov 64   ;;  %v502_v29 = vld [vmem:[#allocation1 + $0x58] sm:$0x2]  }
  0x31   :  { %v492_v25 = vld [vmem:[#allocation1 + $0xd7] sm:$0x8]   ;;  %441 = vrot.lane.b32.xlu0 %v440_v14, %s867_s0  ;;  %459 = vrot.lane.b32.xlu1 %v458_v15, %s868_s26  ;;  %v472_v27 = vsel %vm167_vm1, %v470_v17, %v468_v22  ;;  %v490_v28 = vsel %vm167_vm1, %v488_v24, %v486_v23  ;;  %v506_v30 = vld [vmem:[#allocation1 + $0x97] sm:$0x4]   ;;  %v504_v34 = vsel %vm163_vm0, %v502_v29, %v500_v26  ;;  %v518_v35 = vld [vmem:[#allocation1 + $0x18] sm:$0x1]  }
  0x32   :  { %v510_v31 = vld [vmem:[#allocation1 + $0xd6] sm:$0x8]   ;;  %v476_v32 = vsel %vm171_vm2, %v474_v18, %v472_v27  ;;  %v494_v33 = vsel %vm171_vm2, %v492_v25, %v490_v28  ;;  %v520_v36 = vld [vmem:[#allocation1 + $0x57] sm:$0x2]   ;;  %v508_v38 = vsel %vm167_vm1, %v506_v30, %v504_v34  ;;  %v536_v41 = vld [vmem:[#allocation1 + $0x13] sm:$0x1]  }
  0x33   :  { %v524_v37 = vld [vmem:[#allocation1 + $0x96] sm:$0x4]   ;;  %v522_v39 = vsel %vm163_vm0, %v520_v36, %v518_v35  ;;  %v538_v42 = vld [vmem:[#allocation1 + $0x52] sm:$0x2]   ;;  %v554_v46 = vld [vmem:[#allocation1 + $0x12] sm:$0x1]   ;;  %v512_v49 = vsel %vm171_vm2, %v510_v31, %v508_v38 }
  0x34   :  { %v528_v40 = vld [vmem:[#allocation1 + $0xd5] sm:$0x8]   ;;  %v526_v43 = vsel %vm167_vm1, %v524_v37, %v522_v39  ;;  %v540_v44 = vsel %vm163_vm0, %v538_v42, %v536_v41  ;;  %v542_v45 = vld [vmem:[#allocation1 + $0x91] sm:$0x4]   ;;  %s869_s27 = smov 60   ;;  %s870_s28 = smov 56  }
  0x35   :  { %477 = vrot.lane.b32.xlu0 %v476_v32, %s869_s27  ;;  %495 = vrot.lane.b32.xlu1 %v494_v33, %s870_s28  ;;  %v556_v47 = vld [vmem:[#allocation1 + $0x51] sm:$0x2]   ;;  %v530_v50 = vsel %vm171_vm2, %v528_v40, %v526_v43  ;;  %v546_v51 = vld [vmem:[#allocation1 + $0xd0] sm:$0x8]   ;;  %v572_v53 = vld [vmem:[#allocation1 + $0x11] sm:$0x1]   ;;  %v544_v55 = vsel %vm167_vm1, %v542_v45, %v540_v44 }
  0x36   :  { %v560_v48 = vld [vmem:[#allocation1 + $0x90] sm:$0x4]   ;;  %v558_v52 = vsel %vm163_vm0, %v556_v47, %v554_v46  ;;  %v574_v54 = vld [vmem:[#allocation1 + $0x50] sm:$0x2]   ;;  %v590_v58 = vld [vmem:[#allocation1 + $0x10] sm:$0x1]   ;;  %v548_v2 = vsel %vm171_vm2, %v546_v51, %v544_v55 }
  0x37   :  { %v562_v56 = vsel %vm167_vm1, %v560_v48, %v558_v52  ;;  %v564_v57 = vld [vmem:[#allocation1 + $0xcf] sm:$0x8]   ;;  %v592_v59 = vld [vmem:[#allocation1 + $0x4f] sm:$0x2]   ;;  %v576_v60 = vsel %vm163_vm0, %v574_v54, %v572_v53  ;;  %v578_v61 = vld [vmem:[#allocation1 + $0x8f] sm:$0x4]  }
  0x38   :  { %v594_v62 = vsel %vm163_vm0, %v592_v59, %v590_v58  ;;  %v596_v63 = vld [vmem:[#allocation1 + $0x8e] sm:$0x4]   ;;  %s871_s29 = smov 52   ;;  %s872_s30 = smov 48   ;;  %v608_v0 = vld [vmem:[#allocation1 + $0xb] sm:$0x1]   ;;  %v566_v3 = vsel %vm171_vm2, %v564_v57, %v562_v56  ;;  %v580_v6 = vsel %vm167_vm1, %v578_v61, %v576_v60 }
  0x39   :  { %513 = vrot.lane.b32.xlu0 %v512_v49, %s871_s29  ;;  %531 = vrot.lane.b32.xlu1 %v530_v50, %s872_s30  ;;  %v610_v1 = vld [vmem:[#allocation1 + $0x4a] sm:$0x2]   ;;  %v626_v4 = vld [vmem:[#allocation1 + $0xa] sm:$0x1]   ;;  %v582_v7 = vld [vmem:[#allocation1 + $0xce] sm:$0x8]   ;;  %v598_v8 = vsel %vm167_vm1, %v596_v63, %v594_v62 }
  0x3a   :  { %v628_v5 = vld [vmem:[#allocation1 + $0x49] sm:$0x2]   ;;  %v600_v9 = vld [vmem:[#allocation1 + $0xcd] sm:$0x8]   ;;  %v612_v10 = vsel %vm163_vm0, %v610_v1, %v608_v0  ;;  %v614_v11 = vld [vmem:[#allocation1 + $0x89] sm:$0x4]   ;;  %v584_v18 = vsel %vm171_vm2, %v582_v7, %v580_v6 }
  0x3b   :  { %v630_v12 = vsel %vm163_vm0, %v628_v5, %v626_v4  ;;  %v632_v13 = vld [vmem:[#allocation1 + $0x88] sm:$0x4]   ;;  %v644_v14 = vld [vmem:[#allocation1 + $0x9] sm:$0x1]   ;;  %s873_s2 = smov 44   ;;  %s874_s3 = smov 40   ;;  %v602_v19 = vsel %vm171_vm2, %v600_v9, %v598_v8  ;;  %v616_v20 = vsel %vm167_vm1, %v614_v11, %v612_v10 }
  0x3c   :  { %v646_v15 = vld [vmem:[#allocation1 + $0x48] sm:$0x2]   ;;  %v662_v16 = vld [vmem:[#allocation1 + $0x8] sm:$0x1]   ;;  %v618_v21 = vld [vmem:[#allocation1 + $0xc8] sm:$0x8]   ;;  %v634_v22 = vsel %vm167_vm1, %v632_v13, %v630_v12 }
  0x3d   :  { %549 = vrot.lane.b32.xlu0 %v548_v2, %s873_s2  ;;  %567 = vrot.lane.b32.xlu1 %v566_v3, %s874_s3  ;;  %v664_v17 = vld [vmem:[#allocation1 + $0x47] sm:$0x2]   ;;  %v636_v23 = vld [vmem:[#allocation1 + $0xc7] sm:$0x8]   ;;  %v648_v24 = vsel %vm163_vm0, %v646_v15, %v644_v14  ;;  %v650_v25 = vld [vmem:[#allocation1 + $0x87] sm:$0x4]   ;;  %v620_v32 = vsel %vm171_vm2, %v618_v21, %v616_v20 }
  0x3e   :  { %v666_v26 = vsel %vm163_vm0, %v664_v17, %v662_v16  ;;  %v668_v27 = vld [vmem:[#allocation1 + $0x86] sm:$0x4]   ;;  %v680_v28 = vld [vmem:[#allocation1 + $0x3] sm:$0x1]   ;;  %s875_s4 = smov 36   ;;  %s876_s5 = smov 32   ;;  %v638_v33 = vsel %vm171_vm2, %v636_v23, %v634_v22  ;;  %v652_v37 = vsel %vm167_vm1, %v650_v25, %v648_v24 }
  0x3f   :  { %v682_v29 = vld [vmem:[#allocation1 + $0x42] sm:$0x2]   ;;  %v698_v30 = vld [vmem:[#allocation1 + $0x2] sm:$0x1]   ;;  %v160_v34 = vld [vmem:[#allocation1] sm:$0x1]   ;;  %v670_v39 = vsel %vm167_vm1, %v668_v27, %v666_v26 }
  0x40   :  { %v700_v31 = vld [vmem:[#allocation1 + $0x41] sm:$0x2]   ;;  %v162_v35 = vld [vmem:[#allocation1 + $0x3f] sm:$0x2]   ;;  %v654_v38 = vld [vmem:[#allocation1 + $0xc6] sm:$0x8]   ;;  %v684_v43 = vsel %vm163_vm0, %v682_v29, %v680_v28 }
  0x41   :  { %585 = vrot.lane.b32.xlu0 %v584_v18, %s875_s4  ;;  %603 = vrot.lane.b32.xlu1 %v602_v19, %s876_s5  ;;  %v166_v36 = vld [vmem:[#allocation1 + $0x7e] sm:$0x4]   ;;  %v672_v40 = vld [vmem:[#allocation1 + $0xc5] sm:$0x8]   ;;  %v164_v41 = vsel %vm163_vm0, %v162_v35, %v160_v34  ;;  %v686_v44 = vld [vmem:[#allocation1 + $0x81] sm:$0x4]   ;;  %v702_v45 = vsel %vm163_vm0, %v700_v31, %v698_v30  ;;  %v656_v51 = vsel %vm171_vm2, %v654_v38, %v652_v37 }
  0x42   :  { %v170_v42 = vld [vmem:[#allocation1 + $0xbd] sm:$0x8]   ;;  %v704_v46 = vld [vmem:[#allocation1 + $0x80] sm:$0x4]   ;;  %v168_v47 = vsel %vm167_vm1, %v166_v36, %v164_v41  ;;  %s877_s6 = smov 28   ;;  %s878_s7 = smov 24   ;;  %v674_v52 = vsel %vm171_vm2, %v672_v40, %v670_v39  ;;  %v688_v53 = vsel %vm167_vm1, %v686_v44, %v684_v43 }
  0x43   :  { %v716_v48 = vld [vmem:[#allocation1 + $0x1] sm:$0x1]   ;;  %v172_v50 = vsel %vm171_vm2, %v170_v42, %v168_v47  ;;  %v690_v54 = vld [vmem:[#allocation1 + $0xc0] sm:$0x8]   ;;  %v706_v55 = vsel %vm167_vm1, %v704_v46, %v702_v45  ;;  %v708_v56 = vld [vmem:[#allocation1 + $0xbf] sm:$0x8]  }
  0x44   :  { %v718_v49 = vld [vmem:[#allocation1 + $0x40] sm:$0x2]   ;;  %174 = vst.msk [vmem:[#allocation0] ss:$8 sm:$0xf] %vm173_vm3, %v172_v50   ;;  %s879_s8 = smov 20   ;;  %v692_v59 = vsel %vm171_vm2, %v690_v54, %v688_v53  ;;  %v710_v60 = vsel %vm171_vm2, %v708_v56, %v706_v55 }
  0x45   :  { %621 = vrot.lane.b32.xlu0 %v620_v32, %s877_s6  ;;  %639 = vrot.lane.b32.xlu1 %v638_v33, %s878_s7  ;;  %v720_v57 = vsel %vm163_vm0, %v718_v49, %v716_v48  ;;  %v722_v58 = vld [vmem:[#allocation1 + $0x7f] sm:$0x4]   ;;  %s880_s9 = smov 16   ;;  %s881_s10 = smov 12   ;;  %vm191_vm4 = vcmask 1048544   ;;  %vm209_vm5 = vcmask 1015744  }
  0x46   :  { %v724_v61 = vsel %vm167_vm1, %v722_v58, %v720_v57  ;;  %v726_v62 = vld [vmem:[#allocation1 + $0xbe] sm:$0x8]   ;;  %s882_s11 = smov 8   ;;  %s883_s12 = smov 4   ;;  %vm227_vm6 = vcmask 982944   ;;  %vm245_vm7 = vcmask 950144  }
  0x47   :  { %v728_v63 = vsel %vm171_vm2, %v726_v62, %v724_v61  ;;  %vm263_vm8 = vcmask 917344   ;;  %vm281_vm9 = vcmask 884544   ;;  %vm299_vm10 = vcmask 851744  }
  0x48   :  { %vm317_vm11 = vcmask 818944   ;;  %vm335_vm12 = vcmask 786144   ;;  %vm353_vm13 = vcmask 753344   ;;  %vm371_vm14 = vcmask 720544  }
  0x49   :  { %657 = vrot.lane.b32.xlu0 %v656_v51, %s879_s8  ;;  %675 = vrot.lane.b32.xlu1 %v674_v52, %s880_s9  ;;  %vm389_vm15 = vcmask 687744   ;;  %vm407_vm0 = vcmask 654944   ;;  %vm425_vm1 = vcmask 622144   ;;  %vm443_vm2 = vcmask 589344  }
  0x4a   :  { %vm461_vm3 = vcmask 556544  }
  0x4d   :  { %693 = vrot.lane.b32.xlu0 %v692_v59, %s881_s10  ;;  %711 = vrot.lane.b32.xlu1 %v710_v60, %s882_s11 }
  0x51   :  { %729 = vrot.lane.b32.xlu0 %v728_v63, %s883_s12 }
  0x83   :  { %v190_v0 = vpop.permute.xlu0 %189   ;;  %v226_v1 = vpop.permute.xlu1 %225  }
  0x84   :  { %192 = vst.msk [vmem:[#allocation0] ss:$8 sm:$0xf] %vm191_vm4, %v190_v0   ;;  %vm479_vm4 = vcmask 523744  }
  0x87   :  { %v208_v2 = vpop.permute.xlu0 %207   ;;  %v244_v3 = vpop.permute.xlu1 %243  }
  0x88   :  { %210 = vst.msk [vmem:[#allocation0] ss:$8 sm:$0xf] %vm209_vm5, %v208_v2   ;;  %vm497_vm5 = vcmask 490944  }
  0x89   :  { %228 = vst.msk [vmem:[#allocation0] ss:$8 sm:$0xf] %vm227_vm6, %v226_v1   ;;  %vm515_vm6 = vcmask 458144  }
  0x8a   :  { %246 = vst.msk [vmem:[#allocation0] ss:$8 sm:$0xf] %vm245_vm7, %v244_v3   ;;  %vm533_vm7 = vcmask 425344  }
  0x8b   :  { %v262_v4 = vpop.permute.xlu0 %261   ;;  %v280_v5 = vpop.permute.xlu1 %279  }
  0x8c   :  { %264 = vst.msk [vmem:[#allocation0] ss:$8 sm:$0xf] %vm263_vm8, %v262_v4   ;;  %vm551_vm8 = vcmask 392544  }
  0x8d   :  { %282 = vst.msk [vmem:[#allocation0] ss:$8 sm:$0xf] %vm281_vm9, %v280_v5   ;;  %vm569_vm9 = vcmask 359744  }
  0x8f   :  { %v298_v6 = vpop.permute.xlu0 %297   ;;  %v316_v7 = vpop.permute.xlu1 %315  }
  0x90   :  { %300 = vst.msk [vmem:[#allocation0] ss:$8 sm:$0xf] %vm299_vm10, %v298_v6   ;;  %vm587_vm10 = vcmask 326944  }
  0x91   :  { %318 = vst.msk [vmem:[#allocation0] ss:$8 sm:$0xf] %vm317_vm11, %v316_v7   ;;  %vm605_vm11 = vcmask 294144  }
  0x93   :  { %v334_v8 = vpop.permute.xlu0 %333   ;;  %v352_v9 = vpop.permute.xlu1 %351  }
  0x94   :  { %336 = vst.msk [vmem:[#allocation0] ss:$8 sm:$0xf] %vm335_vm12, %v334_v8   ;;  %vm623_vm12 = vcmask 261344  }
  0x95   :  { %354 = vst.msk [vmem:[#allocation0] ss:$8 sm:$0xf] %vm353_vm13, %v352_v9   ;;  %vm641_vm13 = vcmask 228544  }
  0x98   :  { %v370_v10 = vpop.permute.xlu0 %369   ;;  %v388_v11 = vpop.permute.xlu1 %387  }
  0x99   :  { %372 = vst.msk [vmem:[#allocation0] ss:$8 sm:$0xf] %vm371_vm14, %v370_v10   ;;  %vm659_vm14 = vcmask 195744  }
  0x9a   :  { %390 = vst.msk [vmem:[#allocation0] ss:$8 sm:$0xf] %vm389_vm15, %v388_v11   ;;  %vm677_vm15 = vcmask 162944  }
  0x9e   :  { %v406_v12 = vpop.permute.xlu0 %405   ;;  %v424_v13 = vpop.permute.xlu1 %423  }
  0x9f   :  { %408 = vst.msk [vmem:[#allocation0] ss:$8 sm:$0xf] %vm407_vm0, %v406_v12   ;;  %vm695_vm0 = vcmask 130144  }
  0xa0   :  { %426 = vst.msk [vmem:[#allocation0] ss:$8 sm:$0xf] %vm425_vm1, %v424_v13   ;;  %vm713_vm1 = vcmask 97344  }
  0xa3   :  { %v442_v14 = vpop.permute.xlu0 %441   ;;  %v460_v15 = vpop.permute.xlu1 %459  }
  0xa4   :  { %444 = vst.msk [vmem:[#allocation0] ss:$8 sm:$0xf] %vm443_vm2, %v442_v14   ;;  %vm731_vm2 = vcmask 64544  }
  0xa5   :  { %462 = vst.msk [vmem:[#allocation0] ss:$8 sm:$0xf] %vm461_vm3, %v460_v15  }
  0xa7   :  { %v478_v16 = vpop.permute.xlu0 %477   ;;  %v496_v17 = vpop.permute.xlu1 %495  }
  0xa8   :  { %480 = vst.msk [vmem:[#allocation0] ss:$8 sm:$0xf] %vm479_vm4, %v478_v16  }
  0xa9   :  { %498 = vst.msk [vmem:[#allocation0] ss:$8 sm:$0xf] %vm497_vm5, %v496_v17  }
  0xab   :  { %v514_v18 = vpop.permute.xlu0 %513   ;;  %v532_v19 = vpop.permute.xlu1 %531  }
  0xac   :  { %516 = vst.msk [vmem:[#allocation0] ss:$8 sm:$0xf] %vm515_vm6, %v514_v18  }
  0xad   :  { %534 = vst.msk [vmem:[#allocation0] ss:$8 sm:$0xf] %vm533_vm7, %v532_v19  }
  0xaf   :  { %v550_v20 = vpop.permute.xlu0 %549   ;;  %v568_v21 = vpop.permute.xlu1 %567  }
  0xb0   :  { %552 = vst.msk [vmem:[#allocation0] ss:$8 sm:$0xf] %vm551_vm8, %v550_v20  }
  0xb1   :  { %570 = vst.msk [vmem:[#allocation0] ss:$8 sm:$0xf] %vm569_vm9, %v568_v21  }
  0xb3   :  { %v586_v22 = vpop.permute.xlu0 %585   ;;  %v604_v23 = vpop.permute.xlu1 %603  }
  0xb4   :  { %588 = vst.msk [vmem:[#allocation0] ss:$8 sm:$0xf] %vm587_vm10, %v586_v22  }
  0xb5   :  { %606 = vst.msk [vmem:[#allocation0] ss:$8 sm:$0xf] %vm605_vm11, %v604_v23  }
  0xb7   :  { %v622_v24 = vpop.permute.xlu0 %621   ;;  %v640_v25 = vpop.permute.xlu1 %639  }
  0xb8   :  { %624 = vst.msk [vmem:[#allocation0] ss:$8 sm:$0xf] %vm623_vm12, %v622_v24  }
  0xb9   :  { %642 = vst.msk [vmem:[#allocation0] ss:$8 sm:$0xf] %vm641_vm13, %v640_v25  }
  0xbb   :  { %v658_v26 = vpop.permute.xlu0 %657   ;;  %v676_v27 = vpop.permute.xlu1 %675  }
  0xbc   :  { %660 = vst.msk [vmem:[#allocation0] ss:$8 sm:$0xf] %vm659_vm14, %v658_v26  }
  0xbd   :  { %678 = vst.msk [vmem:[#allocation0] ss:$8 sm:$0xf] %vm677_vm15, %v676_v27  }
  0xbf   :  { %v694_v28 = vpop.permute.xlu0 %693   ;;  %v712_v29 = vpop.permute.xlu1 %711  }
  0xc0   :  { %696 = vst.msk [vmem:[#allocation0] ss:$8 sm:$0xf] %vm695_vm0, %v694_v28  }
  0xc1   :  { %714 = vst.msk [vmem:[#allocation0] ss:$8 sm:$0xf] %vm713_vm1, %v712_v29  }
  0xc3   :  { %v730_v30 = vpop.permute.xlu0 %729  }
  0xc4   :  { %732 = vst.msk [vmem:[#allocation0] ss:$8 sm:$0xf] %vm731_vm2, %v730_v30  }
  0xcb   :  { %v736_v31 = vld [vmem:[#allocation0] sm:$0x1]  ;;  %v740_v32 = vld [vmem:[#allocation0 + $0x8] sm:$0x1]  ;;  %v745_v33 = vld [vmem:[#allocation0 + $0x10] sm:$0x1] }
  0xcc   :  { %738 = vst [vmem:[%s1100_s1] sm:$0x1] %v736_v31  ;;  %819 = vst [vmem:[%s1100_s1 + $0x1] sm:$0x1] %v740_v32  ;;  %v751_v34 = vld [vmem:[#allocation0 + $0x18] sm:$0x1] }
  0xcd   :  { %820 = vst [vmem:[%s1100_s1 + $0x2] sm:$0x1] %v745_v33  ;;  %821 = vst [vmem:[%s1100_s1 + $0x3] sm:$0x1] %v751_v34 }

// kernel: neural_fourier_block.2
= control target key start
LH: loop header
LB: loop body
LE: loop exit
PB: predicated region body
PF: predicated region fallthrough
CT: control target
= control target key end

     0   :  { %s232_s0 = inlined_call_operand.vmem [shape: f32[4,2,128], index: 0, kind: input, shape index: {}]   ;;  %s233_s1 = inlined_call_operand.vmem [shape: f32[4,2,128], index: 1, kind: input, shape index: {}]   ;;  %s234_s2 = inlined_call_operand.vmem [shape: f32[4,1,128], index: 2, kind: input, shape index: {}]   ;;  %s235_s3 = inlined_call_operand.vmem [shape: f32[4,1,128], index: 3, kind: input, shape index: {}]   ;;  %s236_s4 = inlined_call_operand.vmem [shape: f32[2,2,128], index: 4, kind: output, shape index: {}]  }
   0x1   :  { %v17_v0 = vld [vmem:[%s232_s0] sm:$0x3]  ;;  %v134_v6 = vld [vmem:[%s232_s0 + $0x2] sm:$0x3]  ;;  %v140_v13 = vld [vmem:[%s232_s0 + $0x4] sm:$0x3] }
   0x2   :  { %v18_v1 = vld [vmem:[%s233_s1] sm:$0x3]  ;;  %v135_v7 = vld [vmem:[%s233_s1 + $0x2] sm:$0x3]  ;;  %v141_v14 = vld [vmem:[%s233_s1 + $0x4] sm:$0x3] }
   0x3   :  { %v132_v2 = vld [vmem:[%s234_s2] ss:$0 sm:$0xff]  ;;  %v138_v10 = vld [vmem:[%s234_s2 + $0x1] ss:$0 sm:$0xff]  ;;  %v144_v15 = vld [vmem:[%s234_s2 + $0x2] ss:$0 sm:$0xff] }
   0x4   :  { %v133_v3 = vld [vmem:[%s235_s3] ss:$0 sm:$0xff]  ;;  %v27_v4 = vmul.f32 %v132_v2, %v17_v0  ;;  %v37_v5 = vmul.f32 %v132_v2, %v18_v1  ;;  %v139_v11 = vld [vmem:[%s235_s3 + $0x1] ss:$0 sm:$0xff]  ;;  %v55_v12 = vmul.f32 %v138_v10, %v134_v6  ;;  %v65_v16 = vmul.f32 %v138_v10, %v135_v7  ;;  %v145_v21 = vld [vmem:[%s235_s3 + $0x2] ss:$0 sm:$0xff] }
   0x5   :  { %v35_v8 = vmul.f32 %v133_v3, %v18_v1  ;;  %v39_v9 = vmul.f32 %v133_v3, %v17_v0  ;;  %v63_v18 = vmul.f32 %v139_v11, %v135_v7  ;;  %v67_v20 = vmul.f32 %v139_v11, %v134_v6  ;;  %v146_v26 = vld [vmem:[%s232_s0 + $0x6] sm:$0x3]  ;;  %v150_v28 = vld [vmem:[%s234_s2 + $0x3] ss:$0 sm:$0xff] }
   0x6   :  { %v83_v23 = vmul.f32 %v144_v15, %v140_v13  ;;  %v93_v25 = vmul.f32 %v144_v15, %v141_v14  ;;  %v147_v27 = vld [vmem:[%s233_s1 + $0x6] sm:$0x3]  ;;  %v91_v30 = vmul.f32 %v145_v21, %v141_v14  ;;  %v95_v32 = vmul.f32 %v145_v21, %v140_v13  ;;  %v151_v33 = vld [vmem:[%s235_s3 + $0x3] ss:$0 sm:$0xff] }
   0x7   :  { %v36_v17 = vsub.f32 %v27_v4, %v35_v8  ;;  %v40_v19 = vadd.f32 %v39_v9, %v37_v5  ;;  %v111_v35 = vmul.f32 %v150_v28, %v146_v26  ;;  %v121_v37 = vmul.f32 %v150_v28, %v147_v27 }
   0x8   :  { %v119_v39 = vmul.f32 %v151_v33, %v147_v27  ;;  %v123_v41 = vmul.f32 %v151_v33, %v146_v26 }
   0x9   :  { %v56_v22 = vadd.f32 %v55_v12, %v36_v17  ;;  %v66_v24 = vadd.f32 %v65_v16, %v40_v19 }
   0xb   :  { %v64_v29 = vsub.f32 %v56_v22, %v63_v18  ;;  %v68_v31 = vadd.f32 %v67_v20, %v66_v24 }
   0xd   :  { %v84_v34 = vadd.f32 %v83_v23, %v64_v29  ;;  %v94_v36 = vadd.f32 %v93_v25, %v68_v31 }
   0xf   :  { %v92_v38 = vsub.f32 %v84_v34, %v91_v30  ;;  %v96_v40 = vadd.f32 %v95_v32, %v94_v36 }
  0x11   :  { %v112_v42 = vadd.f32 %v111_v35, %v92_v38  ;;  %v122_v43 = vadd.f32 %v121_v37, %v96_v40 }
  0x13   :  { %v120_v44 = vsub.f32 %v112_v42, %v119_v39  ;;  %v124_v45 = vadd.f32 %v123_v41, %v122_v43 }
  0x15   :  { %125 = vst [vmem:[%s236_s4] sm:$0x3] %v120_v44  ;;  %152 = vst [vmem:[%s236_s4 + $0x2] sm:$0x3] %v124_v45 }

// kernel: reverse.0
= control target key start
LH: loop header
LB: loop body
LE: loop exit
PB: predicated region body
PF: predicated region fallthrough
CT: control target
= control target key end

     0   :  { %v71_v3 = vlaneseq  ;;  %v64_v9 = vld [vmem:[#allocation0 + $0x7] ss:$-1 sm:$0xff]  ;;  %v78_v12 = vld [vmem:[#allocation0 + $0x17] ss:$-1 sm:$0xff]  ;;  %s329_s0 = inlined_call_operand.vmem [shape: f32[2,4,16,7], index: 0, kind: input, shape index: {}]   ;;  %s330_s1 = inlined_call_operand.vmem [shape: f32[2,4,16,7], index: 1, kind: output, shape index: {}]  }
   0x1   :  { %v44_v0 = vld [vmem:[%s329_s0] sm:$0xff]  ;;  %v46_v1 = vld [vmem:[%s329_s0 + $0x8] sm:$0xff]  ;;  %v48_v2 = vld [vmem:[%s329_s0 + $0x10] sm:$0xff]  ;;  %v65_v10 = vrot.slane %v64_v9, 1  ;;  %v79_v14 = vrot.slane %v78_v12, 1 }
   0x2   :  { %45 = vst [vmem:[#allocation0 + $0x8] sm:$0xff] %v44_v0  ;;  %47 = vst [vmem:[#allocation0 + $0x18] sm:$0xff] %v46_v1  ;;  %v50_v4 = vld [vmem:[%s329_s0 + $0x18] sm:$0xff]  ;;  %v52_v5 = vld [vmem:[%s329_s0 + $0x20] sm:$0xff]  ;;  %v72_v11 = vshrl.u32 %v71_v3, 7 }
   0x3   :  { %49 = vst [vmem:[#allocation0 + $0x28] sm:$0xff] %v48_v2  ;;  %v54_v6 = vld [vmem:[%s329_s0 + $0x28] sm:$0xff]  ;;  %51 = vst [vmem:[#allocation0 + $0x38] sm:$0xff] %v50_v4  ;;  %v56_v7 = vld [vmem:[%s329_s0 + $0x30] sm:$0xff] }
   0x4   :  { %53 = vst [vmem:[#allocation0 + $0x48] sm:$0xff] %v52_v5  ;;  %55 = vst [vmem:[#allocation0 + $0x58] sm:$0xff] %v54_v6  ;;  %v58_v8 = vld [vmem:[%s329_s0 + $0x38] sm:$0xff]  ;;  %v92_v13 = vld [vmem:[#allocation0 + $0x27] ss:$-1 sm:$0xff]  ;;  %vm73_vm0 = vcmp.lt.s32.totalorder %v72_v11, 7 }
   0x5   :  { %57 = vst [vmem:[#allocation0 + $0x68] sm:$0xff] %v56_v7  ;;  %59 = vst [vmem:[#allocation0 + $0x78] sm:$0xff] %v58_v8  ;;  %v93_v15 = vrot.slane %v92_v13, 1  ;;  %v106_v16 = vld [vmem:[#allocation0 + $0x37] ss:$-1 sm:$0xff] }
   0x6   :  { %66 = vst [vmem:[#allocation1] sm:$0xff] %v65_v10  ;;  %v107_v17 = vrot.slane %v106_v16, 1  ;;  %v120_v18 = vld [vmem:[#allocation0 + $0x47] ss:$-1 sm:$0xff]  ;;  %v134_v19 = vld [vmem:[#allocation0 + $0x57] ss:$-1 sm:$0xff] }
   0x7   :  { %80 = vst [vmem:[#allocation1 + $0x8] sm:$0xff] %v79_v14  ;;  %94 = vst [vmem:[#allocation1 + $0x10] sm:$0xff] %v93_v15  ;;  %v121_v20 = vrot.slane %v120_v18, 1  ;;  %v135_v21 = vrot.slane %v134_v19, 1  ;;  %v148_v22 = vld [vmem:[#allocation0 + $0x67] ss:$-1 sm:$0xff] }
   0x8   :  { %v162_v23 = vld [vmem:[#allocation0 + $0x77] ss:$-1 sm:$0xff]  ;;  %108 = vst [vmem:[#allocation1 + $0x18] sm:$0xff] %v107_v17  ;;  %v149_v24 = vrot.slane %v148_v22, 1 }
   0x9   :  { %v163_v25 = vrot.slane %v162_v23, 1  ;;  %v69_v26 = vld [vmem:[#allocation0 + $0xf] ss:$-1 sm:$0xff]  ;;  %v83_v27 = vld [vmem:[#allocation0 + $0x1f] ss:$-1 sm:$0xff]  ;;  %122 = vst [vmem:[#allocation1 + $0x20] sm:$0xff] %v121_v20 }
   0xa   :  { %v97_v28 = vld [vmem:[#allocation0 + $0x2f] ss:$-1 sm:$0xff]  ;;  %136 = vst [vmem:[#allocation1 + $0x28] sm:$0xff] %v135_v21  ;;  %v70_v29 = vrot.slane %v69_v26, 1  ;;  %v84_v30 = vrot.slane %v83_v27, 1  ;;  %150 = vst [vmem:[#allocation1 + $0x30] sm:$0xff] %v149_v24 }
   0xb   :  { %v98_v31 = vrot.slane %v97_v28, 1  ;;  %v111_v32 = vld [vmem:[#allocation0 + $0x3f] ss:$-1 sm:$0xff]  ;;  %164 = vst [vmem:[#allocation1 + $0x38] sm:$0xff] %v163_v25  ;;  %v125_v34 = vld [vmem:[#allocation0 + $0x4f] ss:$-1 sm:$0xff] }
   0xc   :  { %v112_v33 = vrot.slane %v111_v32, 1  ;;  %v139_v35 = vld [vmem:[#allocation0 + $0x5f] ss:$-1 sm:$0xff]  ;;  %74 = vst.msk [vmem:[#allocation1] sm:$0xff] %vm73_vm0, %v70_v29  ;;  %88 = vst.msk [vmem:[#allocation1 + $0x8] sm:$0xff] %vm73_vm0, %v84_v30  ;;  %v126_v36 = vrot.slane %v125_v34, 1 }
   0xd   :  { %102 = vst.msk [vmem:[#allocation1 + $0x10] sm:$0xff] %vm73_vm0, %v98_v31  ;;  %v140_v37 = vrot.slane %v139_v35, 1  ;;  %v153_v38 = vld [vmem:[#allocation0 + $0x6f] ss:$-1 sm:$0xff]  ;;  %v167_v39 = vld [vmem:[#allocation0 + $0x7f] ss:$-1 sm:$0xff] }
   0xe   :  { %116 = vst.msk [vmem:[#allocation1 + $0x18] sm:$0xff] %vm73_vm0, %v112_v33  ;;  %v154_v40 = vrot.slane %v153_v38, 1  ;;  %v168_v41 = vrot.slane %v167_v39, 1  ;;  %130 = vst.msk [vmem:[#allocation1 + $0x20] sm:$0xff] %vm73_vm0, %v126_v36 }
   0xf   :  { %144 = vst.msk [vmem:[#allocation1 + $0x28] sm:$0xff] %vm73_vm0, %v140_v37 }
  0x10   :  { %158 = vst.msk [vmem:[#allocation1 + $0x30] sm:$0xff] %vm73_vm0, %v154_v40  ;;  %172 = vst.msk [vmem:[#allocation1 + $0x38] sm:$0xff] %vm73_vm0, %v168_v41 }
  0x13   :  { %v214_v42 = vld [vmem:[#allocation1] sm:$0xff]  ;;  %v216_v43 = vld [vmem:[#allocation1 + $0x8] sm:$0xff] }
  0x14   :  { %v218_v44 = vld [vmem:[#allocation1 + $0x10] sm:$0xff]  ;;  %215 = vst [vmem:[%s330_s1] sm:$0xff] %v214_v42  ;;  %217 = vst [vmem:[%s330_s1 + $0x8] sm:$0xff] %v216_v43 }
  0x15   :  { %219 = vst [vmem:[%s330_s1 + $0x10] sm:$0xff] %v218_v44  ;;  %v220_v45 = vld [vmem:[#allocation1 + $0x18] sm:$0xff]  ;;  %v222_v46 = vld [vmem:[#allocation1 + $0x20] sm:$0xff] }
  0x16   :  { %221 = vst [vmem:[%s330_s1 + $0x18] sm:$0xff] %v220_v45  ;;  %v224_v47 = vld [vmem:[#allocation1 + $0x28] sm:$0xff]  ;;  %223 = vst [vmem:[%s330_s1 + $0x20] sm:$0xff] %v222_v46 }
  0x17   :  { %225 = vst [vmem:[%s330_s1 + $0x28] sm:$0xff] %v224_v47  ;;  %v226_v48 = vld [vmem:[#allocation1 + $0x30] sm:$0xff]  ;;  %v228_v49 = vld [vmem:[#allocation1 + $0x38] sm:$0xff] }
  0x18   :  { %227 = vst [vmem:[%s330_s1 + $0x30] sm:$0xff] %v226_v48  ;;  %229 = vst [vmem:[%s330_s1 + $0x38] sm:$0xff] %v228_v49 }

// kernel: neural_fourier_block.3
= control target key start
LH: loop header
LB: loop body
LE: loop exit
PB: predicated region body
PF: predicated region fallthrough
CT: control target
= control target key end

     0   :  { %vm31_vm0 = vcmask 1043456   ;;  %v289_v1 = vmov 0.0   ;;  %vm27_vm1 = vcmask 31744   ;;  %v290_v36 = vmov 0   ;;  %s361_s0 = inlined_call_operand.vmem [shape: f32[4,512], index: 0, kind: input, shape index: {}]   ;;  %s362_s2 = inlined_call_operand.vmem [shape: f32[4,4], index: 2, kind: input, shape index: {}]   ;;  %s363_s1 = inlined_call_operand.vmem [shape: f32[4,512], index: 1, kind: input, shape index: {}]   ;;  %s364_s3 = inlined_call_operand.vmem [shape: f32[4,1], index: 3, kind: input, shape index: {}]   ;;  %s365_s4 = inlined_call_operand.vmem [shape: f32[4,1], index: 4, kind: input, shape index: {}]   ;;  %s366_s5 = inlined_call_operand.vmem [shape: f32[4,512], index: 5, kind: output, shape index: {}]  }
   0x1   :  { %v20_v0 = vld [vmem:[%s361_s0] sm:$0xff]  ;;  %104 = vmatprep.mubr.f32.mxu0 %v289_v1  ;;  %v21_v2 = vld [vmem:[%s361_s0 + $0x8] sm:$0xff]  ;;  %175 = vmatprep.mubr.f32.mxu1 %v289_v1  ;;  %v291_v51 = vmov 839922192   ;;  %v245_v53 = vlaneseq }
   0x2   :  { %v25_v3 = vcombine.high %v20_v0, %v20_v0  ;;  %v26_v4 = vcombine.high %v21_v2, %v21_v2  ;;  %v22_v5 = vld [vmem:[%s362_s2] sm:$0xf]  ;;  %v183_v11 = vld [vmem:[%s363_s1 + $0x8] sm:$0xff]  ;;  %283 = vset.pattern.permute.xlu1 %v290_v36  ;;  %284 = vset.pattern.permute.xlu0 %v290_v36  ;;  %v243_v52 = vunpack.c.l.s4 %v291_v51 }
   0x3   :  { %v182_v9 = vld [vmem:[%s363_s1] sm:$0xff]  ;;  %v246_v55 = vshrl.u32 %v245_v53, 7 }
   0x4   :  { %274 = vmatprep.subr.msk.mxu0 %vm31_vm0, %v25_v3  ;;  %277 = vmatprep.subr.msk.mxu1 %vm31_vm0, %v26_v4  ;;  %v233_v45 = vld [vmem:[%s364_s3] sm:$0xf]  ;;  %v244_v54 = vunpack.c.0.s8 %v243_v52 }
   0x5   :  { %275 = vmatpush1.msk.msra.mxu0 %vm31_vm0, %v20_v0  ;;  %278 = vmatpush1.msk.msra.mxu1 %vm31_vm0, %v21_v2  ;;  %v235_v48 = vld [vmem:[%s365_s4] sm:$0xf] }
   0x6   :  { %276 = vmatmul.mubr.msk.f32.vlgmr.msra.gmra.mrb[0].mxu0 %vm27_vm1, %v22_v5  ;;  %279 = vmatmul.mubr.msk.f32.vlgmr.msra.gmra.mrb[0].mxu1 %vm27_vm1, %v22_v5  ;;  %v247_v56 = vsub.s32 %v244_v54, %v246_v55 }
  0xd9   :  { %v106_v6 = vpop.f32.mrb[0].mxu0  ;;  %v177_v7 = vpop.f32.mrb[0].mxu1 }
  0xda   :  { %v108_v8 = vpop.f32.mrb[1].mxu0  ;;  %v179_v10 = vpop.f32.mrb[1].mxu1 }
  0xdb   :  { %v188_v12 = vcombine.low %v106_v6, %v108_v8  ;;  %v189_v13 = vcombine.low %v177_v7, %v179_v10 }
  0xdd   :  { %v192_v14 = vadd.f32 %v188_v12, %v182_v9  ;;  %v193_v15 = vadd.f32 %v189_v13, %v183_v11 }
  0xdf   :  { %v196_v16 = vcombine.high %v192_v14, %v192_v14  ;;  %v197_v17 = vcombine.high %v193_v15, %v193_v15  ;;  %v209_v18 = vmul.f32 %v192_v14, %v192_v14  ;;  %v210_v19 = vmul.f32 %v193_v15, %v193_v15 }
  0xe0   :  { %v200_v20 = vsel %vm31_vm0, %v192_v14, 0.0  ;;  %v203_v22 = vsel %vm31_vm0, %v193_v15, 0.0 }
  0xe1   :  { %v201_v21 = vsel %vm31_vm0, %v196_v16, 0.0  ;;  %v213_v24 = vcombine.high %v209_v18, %v209_v18  ;;  %v205_v25 = vsel %vm31_vm0, %v197_v17, 0.0  ;;  %v214_v26 = vcombine.high %v210_v19, %v210_v19 }
  0xe2   :  { %v202_v23 = vadd.f32 %v201_v21, %v200_v20  ;;  %v217_v28 = vsel %vm31_vm0, %v209_v18, 0.0  ;;  %v220_v30 = vsel %vm31_vm0, %v210_v19, 0.0 }
  0xe3   :  { %v218_v29 = vsel %vm31_vm0, %v213_v24, 0.0  ;;  %v222_v34 = vsel %vm31_vm0, %v214_v26, 0.0 }
  0xe4   :  { %v204_v27 = vadd.f32 %v203_v22, %v202_v23  ;;  %v219_v31 = vadd.f32 %v218_v29, %v217_v28 }
  0xe6   :  { %v206_v32 = vadd.f32 %v205_v25, %v204_v27  ;;  %v221_v33 = vadd.f32 %v220_v30, %v219_v31 }
  0xe8   :  { %207 = vadd.xlane.f32.xlu0 %v206_v32  ;;  %v223_v35 = vadd.f32 %v222_v34, %v221_v33 }
  0xec   :  { %224 = vadd.xlane.f32.xlu0 %v223_v35 }
 0x175   :  { %v208_v37 = vpop.xlane.xlu0 %207 }
 0x176   :  { %v226_v38 = vmul.f32 0.001953125, %v208_v37 }
 0x178   :  { %v228_v40 = vmul.f32 %v226_v38, %v226_v38 }
 0x179   :  { %v225_v39 = vpop.xlane.xlu0 %224 }
 0x17a   :  { %v227_v41 = vmul.f32 0.001953125, %v225_v39 }
 0x17c   :  { %v229_v42 = vsub.f32 %v227_v41, %v228_v40 }
 0x17e   :  { %v230_v43 = vmax.f32 %v229_v42, 0.0 }
 0x180   :  { %v231_v44 = vadd.f32 1e-05, %v230_v43 }
 0x182   :  { %287 = vrsqrt.f32 %v231_v44 }
 0x18c   :  { %v288_v46 = vpop.eup %287 }
 0x18d   :  { %v234_v47 = vmul.f32 %v288_v46, %v233_v45 }
 0x18f   :  { %240 = vperm.xlu1 %283, %v234_v47   ;;  %v236_v49 = vmul.f32 %v234_v47, %v226_v38 }
 0x191   :  { %v237_v50 = vsub.f32 %v235_v48, %v236_v49 }
 0x193   :  { %254 = vperm.xlu1 %283, %v237_v50  }
 0x20e   :  { %v241_v57 = vpop.permute.xlu1 %240 }
 0x20f   :  { %v248_v58 = vrot.slane %v241_v57, %v247_v56 }
 0x211   :  { %v250_v60 = vmul.f32 %v248_v58, %v192_v14  ;;  %v251_v61 = vmul.f32 %v248_v58, %v193_v15 }
 0x212   :  { %v255_v59 = vpop.permute.xlu1 %254 }
 0x213   :  { %v262_v62 = vrot.slane %v255_v59, %v247_v56 }
 0x215   :  { %v264_v63 = vadd.f32 %v262_v62, %v250_v60  ;;  %v265_v0 = vadd.f32 %v262_v62, %v251_v61 }
 0x217   :  { %v266_v1 = vmax.f32 %v264_v63, 0.0  ;;  %v267_v2 = vmax.f32 %v265_v0, 0.0 }
 0x219   :  { %268 = vst [vmem:[%s366_s5] sm:$0xff] %v266_v1  ;;  %269 = vst [vmem:[%s366_s5 + $0x8] sm:$0xff] %v267_v2 }

</bundles_post_ra>
